<compile_context>
chip_gen: v7x
topology: tpu7x:2x2x1
jax: 0.10.0
libtpu: 0.0.40
codegen_flags: <defaults>
</compile_context>

<pallas_src>
import numpy as np
import jax
import jax.numpy as jnp
from jax.experimental import pallas as pl
from jax.experimental.pallas import tpu as pltpu

N_TILE = 512   # lane / contraction tile for the node axis (multiple of 128)
F_TILE = 512   # contraction tile for the feature axis (multiple of 128)


def _round_up(x, m):
    return ((x + m - 1) // m) * m


def _pad_dim(d, tile):
    """Pad a dimension and pick its tile: single 128-aligned block for small
    dims, `tile`-sized blocks (>= 1, usually >= 2 steps) for large dims."""
    if d <= tile:
        p = max(_round_up(d, 128), 128)
        return p, p
    p = _round_up(d, tile)
    return p, tile


# ----------------------------------------------------------------------------
# Pallas kernels (transposed, lane-dense layout)
# ----------------------------------------------------------------------------
def _embed_t_kernel(wt_ref, xt_ref, o_ref, acc_ref):
    # o^T = relu(w_embed^T @ x^T); feature (contraction) axis tiled on grid 1.
    f = pl.program_id(1)

    @pl.when(f == 0)
    def _():
        acc_ref[...] = jnp.zeros_like(acc_ref)

    acc_ref[...] += jnp.dot(wt_ref[...], xt_ref[...],
                            preferred_element_type=jnp.float32)

    @pl.when(f == pl.num_programs(1) - 1)
    def _():
        o_ref[...] = jnp.maximum(acc_ref[...], 0.0).astype(o_ref.dtype)


def embed_t(wt, xt, *, tn, tf):
    """wt: (H, Fpad) bf16, xt: (Fpad, Npad) bf16  ->  (H, Npad) bf16."""
    H, Fp = wt.shape
    Np = xt.shape[1]
    return pl.pallas_call(
        _embed_t_kernel,
        out_shape=jax.ShapeDtypeStruct((H, Np), jnp.bfloat16),
        grid_spec=pltpu.PrefetchScalarGridSpec(
            num_scalar_prefetch=0,
            grid=(Np // tn, Fp // tf),                 # (out cols, contraction)
            in_specs=[
                pl.BlockSpec((H, tf), lambda j, f: (0, f)),
                pl.BlockSpec((tf, tn), lambda j, f: (f, j)),
            ],
            out_specs=pl.BlockSpec((H, tn), lambda j, f: (0, j)),
            scratch_shapes=[pltpu.VMEM((H, tn), jnp.float32)],
        ),
        compiler_params=pltpu.CompilerParams(
            dimension_semantics=("parallel", "arbitrary")),
    )(wt, xt)


def _prop_t_kernel(r_ref, a1_ref, a2_ref, o_ref, acc1_ref, acc2_ref):
    # o^T = relu([r^T @ a1^T ; r^T @ a2^T]); contraction (node axis) tiled on
    # grid axis 1 and accumulated in f32 VMEM scratch.  One shared r tile per
    # step feeds both dots (adjacency streams dominate the HBM traffic).
    kk = pl.program_id(1)

    @pl.when(kk == 0)
    def _():
        acc1_ref[...] = jnp.zeros_like(acc1_ref)
        acc2_ref[...] = jnp.zeros_like(acc2_ref)

    r = r_ref[...]
    acc1_ref[...] += jnp.dot(r, a1_ref[...], preferred_element_type=jnp.float32)
    acc2_ref[...] += jnp.dot(r, a2_ref[...], preferred_element_type=jnp.float32)

    @pl.when(kk == pl.num_programs(1) - 1)
    def _():
        h = acc1_ref.shape[0]
        o_ref[:h, :] = jnp.maximum(acc1_ref[...], 0.0).astype(o_ref.dtype)
        o_ref[h:, :] = jnp.maximum(acc2_ref[...], 0.0).astype(o_ref.dtype)


def propagate_t(r_t, a1_t, a2_t, *, tn, tk):
    """r_t: (Hin, Npad) bf16, a*_t: (Npad, Npad) bf16 -> (2*Hin, Npad) bf16."""
    Hin, Np = r_t.shape
    return pl.pallas_call(
        _prop_t_kernel,
        out_shape=jax.ShapeDtypeStruct((2 * Hin, Np), jnp.bfloat16),
        grid_spec=pltpu.PrefetchScalarGridSpec(
            num_scalar_prefetch=0,
            grid=(Np // tn, Np // tk),                 # (out cols, contraction)
            in_specs=[
                pl.BlockSpec((Hin, tk), lambda j, k: (0, k)),
                pl.BlockSpec((tk, tn), lambda j, k: (k, j)),
                pl.BlockSpec((tk, tn), lambda j, k: (k, j)),
            ],
            out_specs=pl.BlockSpec((2 * Hin, tn), lambda j, k: (0, j)),
            scratch_shapes=[
                pltpu.VMEM((Hin, tn), jnp.float32),
                pltpu.VMEM((Hin, tn), jnp.float32),
            ],
        ),
        compiler_params=pltpu.CompilerParams(
            dimension_semantics=("parallel", "arbitrary"),
        ),
    )(r_t, a1_t, a2_t)


def _pred_kernel(wst_ref, rt_ref, o_ref):
    # fused treatment/control heads: (8, Dfin) @ (Dfin, tn) -> (8, tn) f32
    o_ref[...] = jnp.dot(wst_ref[...], rt_ref[...],
                         preferred_element_type=jnp.float32)


def predict_fused_all(ws_t_pad, r_t, *, tn):
    """ws_t_pad: (8, Dfin) bf16, r_t: (Dfin, Npad) bf16 -> (8, Npad) f32.
    Runs over ALL padded columns (lane-dense tiled output); the tiny dt_idx
    selection happens afterwards on the (2, Npad) result."""
    rows, Dfin = ws_t_pad.shape
    Np = r_t.shape[1]
    return pl.pallas_call(
        _pred_kernel,
        out_shape=jax.ShapeDtypeStruct((rows, Np), jnp.float32),
        grid_spec=pltpu.PrefetchScalarGridSpec(
            num_scalar_prefetch=0,
            grid=(Np // tn,),
            in_specs=[
                pl.BlockSpec((rows, Dfin), lambda j: (0, 0)),   # resident weight
                pl.BlockSpec((Dfin, tn), lambda j: (0, j)),
            ],
            out_specs=pl.BlockSpec((rows, tn), lambda j: (0, j)),
        ),
        compiler_params=pltpu.CompilerParams(dimension_semantics=("parallel",)),
    )(ws_t_pad, r_t)


# ----------------------------------------------------------------------------
# Plain-JAX glue (mirrors H2GCN._prepare_prop with dense adjacency)
# ----------------------------------------------------------------------------
def _prepare_prop(adj):
    n = adj.shape[0]
    eye = jnp.eye(n, dtype=jnp.float32)
    a1 = ((adj - eye) > 0).astype(jnp.float32)                 # _indicator(A - I)
    a2 = ((adj @ adj - adj - eye) > 0).astype(jnp.float32)     # _indicator(A^2 - A - I)

    def adj_norm(a):
        d = jnp.power(jnp.sum(a, axis=1), -0.5)
        d = jnp.where(jnp.isinf(d), jnp.zeros_like(d), d)
        return d[:, None] * a * d[None, :]

    return adj_norm(a1), adj_norm(a2)


def h2gcn_preprocess(adj, *, n_tile=N_TILE):
    """One-time adjacency prep (cached outside the forward): returns the
    transposed, zero-padded, bf16 normalized a1/a2 plus the node-axis tiling.
    # TODO(synk): int8 (v5e/v6e) / fp8-e4m3 (v7x) adjacency storage would halve
    # the dominant HBM stream; kept bf16 here for portable, clean lowering.
    """
    n = adj.shape[0]
    npad, tile_n = _pad_dim(n, n_tile)
    a1, a2 = _prepare_prop(adj)
    a1t = jnp.zeros((npad, npad), jnp.bfloat16).at[:n, :n].set(
        a1.T.astype(jnp.bfloat16))
    a2t = jnp.zeros((npad, npad), jnp.bfloat16).at[:n, :n].set(
        a2.T.astype(jnp.bfloat16))
    return a1t, a2t, n, tile_n


def xavier_uniform(key, shape):
    fan_in, fan_out = shape
    bound = float(np.sqrt(6.0 / (fan_in + fan_out)))
    return jax.random.uniform(key, shape, dtype=jnp.float32,
                              minval=-bound, maxval=bound)


def h2gcn_forward(a1t, a2t, n, tile_n, x, t, dt_idx, params, *, k=2):
    w_embed, w0, w1 = params
    npad = a1t.shape[0]
    feat, hidden = w_embed.shape
    fpad, tile_f = _pad_dim(feat, F_TILE)

    # transpose + zero-pad node-major inputs into the lane-dense layout
    xt = jnp.zeros((fpad, npad), jnp.bfloat16).at[:feat, :n].set(
        x.T.astype(jnp.bfloat16))
    wt = jnp.zeros((hidden, fpad), jnp.bfloat16).at[:, :feat].set(
        w_embed.T.astype(jnp.bfloat16))

    # hop-0 embedding + k propagation hops (all transposed / bf16)
    rs_t = [embed_t(wt, xt, tn=tile_n, tf=tile_f)]
    for _ in range(k):
        rs_t.append(propagate_t(rs_t[-1], a1t, a2t, tn=tile_n, tk=tile_n))
    r_final_t = jnp.concatenate(rs_t, axis=0)                  # (7H, Npad) bf16

    # F.dropout(..., training=self.training): eval mode -> identity

    # fused prediction heads over ALL padded columns (lane-dense, 128-aligned
    # tiled output) -- the dt_idx gather moves to the tiny (2, Npad) result.
    ws_t = jnp.concatenate([w0, w1], axis=1).T                 # (2, 7H): [w0^T; w1^T]
    ws_t_pad = jnp.zeros((8, ws_t.shape[1]), jnp.bfloat16).at[:2, :].set(
        ws_t.astype(jnp.bfloat16))
    preds_all = predict_fused_all(ws_t_pad, r_final_t, tn=tile_n)   # (8, Npad) f32

    # host-side selection + treatment/control split of the tiny prediction
    # vectors only, with the float64 cast done here (single sync at the end).
    preds_np = np.asarray(jax.device_get(preds_all[:2]))       # (2, Npad)
    t_np = np.asarray(jax.device_get(t))
    dt_np = np.asarray(jax.device_get(dt_idx))
    preds_sel = preds_np[:, dt_np]                             # (2, n_sel)
    t_sel = t_np[dt_np]
    idx0 = np.where(t_sel == 0)[0]
    idx1 = np.where(t_sel == 1)[0]
    pred_0 = preds_sel[0, idx0][:, None].astype(np.float64)    # control  @ w0
    pred_1 = preds_sel[1, idx1][:, None].astype(np.float64)    # treated  @ w1
    pred_c0 = preds_sel[0, idx1][:, None].astype(np.float64)   # treated  @ w0
    pred_c1 = preds_sel[1, idx0][:, None].astype(np.float64)   # control  @ w1

    # TODO(synk): geomloss SamplesLoss('sinkhorn', p=2, blur=0.005) imbalance
    # term has no clean Pallas equivalent; returning 0.0 placeholder.
    imbalance_loss = jnp.float32(0.0)

    return pred_0, pred_1, pred_c0, pred_c1, imbalance_loss


# ----------------------------------------------------------------------------
if __name__ == "__main__":
    N, FEAT, HIDDEN, K = 64, 32, 16, 2

    key = jax.random.PRNGKey(0)
    k_adj, k_x, k_t, k_we, k_w0, k_w1 = jax.random.split(key, 6)

    # synthetic symmetric adjacency with self-loops (dense stand-in for sparse adj)
    a_rand = (jax.random.uniform(k_adj, (N, N), dtype=jnp.float32) < 0.1)
    a_rand = a_rand.astype(jnp.float32)
    adj = jnp.clip(a_rand + a_rand.T + jnp.eye(N, dtype=jnp.float32), 0.0, 1.0)

    x = jax.random.normal(k_x, (N, FEAT), dtype=jnp.float32)
    t = (jax.random.uniform(k_t, (N,), dtype=jnp.float32) < 0.5).astype(jnp.int32)
    dt_idx = jnp.arange(48, dtype=jnp.int32)       # subset of nodes used for preds

    # parameters (xavier_uniform, deterministic)
    d_final = (2 ** (K + 1) - 1) * HIDDEN          # 7 * hidden
    w_embed = xavier_uniform(k_we, (FEAT, HIDDEN))
    w0 = xavier_uniform(k_w0, (d_final, 1))
    w1 = xavier_uniform(k_w1, (d_final, 1))

    # adjacency prep is hoisted out of the forward and cached (invariant)
    a1t, a2t, n_nodes, tile_n = h2gcn_preprocess(adj)

    outs = h2gcn_forward(a1t, a2t, n_nodes, tile_n, x, t, dt_idx,
                         (w_embed, w0, w1), k=K)
    jax.block_until_ready(outs)

    pred_0, pred_1, pred_c0, pred_c1, imb = outs
    assert pred_0.dtype == np.float64 and pred_0.shape[1] == 1
    assert pred_1.dtype == np.float64 and pred_c0.dtype == np.float64
    assert pred_c1.dtype == np.float64
    print("KERNEL_OK")
</pallas_src>

<mosaic_0001>
module attributes {stable_mosaic.version = 11 : i64} {
  func.func @_embed_t_kernel(%arg0: i32, %arg1: i32, %arg2: memref<16x128xbf16, #tpu.memory_space<vmem>>, %arg3: memref<128x128xbf16, #tpu.memory_space<vmem>>, %arg4: memref<16x128xbf16, #tpu.memory_space<vmem>>, %arg5: memref<16x128xf32, #tpu.memory_space<vmem>>) attributes {dimension_semantics = [#tpu.dimension_semantics<parallel>, #tpu.dimension_semantics<arbitrary>], iteration_bounds = array<i64: 1, 1>, scalar_prefetch = 0 : i64, scratch_operands = 1 : i64, tpu.core_type = #tpu.core_type<tc>, window_params = [{transform_indices = @transform_0, window_bounds = array<i64: 16, 128>}, {transform_indices = @transform_1, window_bounds = array<i64: 128, 128>}, {transform_indices = @transform_2, window_bounds = array<i64: 16, 128>}]} {
    %c0_i32 = arith.constant 0 : i32
    %0 = arith.cmpi eq, %arg1, %c0_i32 : i32
    %1 = arith.extui %0 : i1 to i32
    %c0_i32_0 = arith.constant 0 : i32
    %2 = arith.cmpi ne, %1, %c0_i32_0 : i32
    scf.if %2 {
      %cst_10 = arith.constant 0.000000e+00 : f32
      %12 = vector.broadcast %cst_10 : f32 to vector<16x128xf32>
      %c0_11 = arith.constant 0 : index
      %c0_12 = arith.constant 0 : index
      %13 = vector.load %arg5[%c0_11, %c0_12] : memref<16x128xf32, #tpu.memory_space<vmem>>, vector<16x128xf32>
      tpu.vector_store %arg5[%c0_11, %c0_12], %12 {strides = array<i32>} : memref<16x128xf32, #tpu.memory_space<vmem>>, vector<16x128xf32>,
    } else {
    }
    %c0 = arith.constant 0 : index
    %c0_1 = arith.constant 0 : index
    %3 = vector.load %arg5[%c0, %c0_1] : memref<16x128xf32, #tpu.memory_space<vmem>>, vector<16x128xf32>
    %c0_2 = arith.constant 0 : index
    %c0_3 = arith.constant 0 : index
    %4 = vector.load %arg2[%c0_2, %c0_3] : memref<16x128xbf16, #tpu.memory_space<vmem>>, vector<16x128xbf16>
    %c0_4 = arith.constant 0 : index
    %c0_5 = arith.constant 0 : index
    %5 = vector.load %arg3[%c0_4, %c0_5] : memref<128x128xbf16, #tpu.memory_space<vmem>>, vector<128x128xbf16>
    %cst = arith.constant dense<0.000000e+00> : vector<16x128xf32>
    %6 = tpu.matmul %4, %5, %cst {dimension_numbers = #tpu.dot_dimension_numbers<[1], [0], [0], [1], [0, 0, 1, 1], [], []>} : vector<16x128xbf16>, vector<128x128xbf16>, vector<16x128xf32> -> vector<16x128xf32>
    %7 = arith.addf %3, %6 : vector<16x128xf32>
    %c0_6 = arith.constant 0 : index
    %c0_7 = arith.constant 0 : index
    %8 = vector.load %arg5[%c0_6, %c0_7] : memref<16x128xf32, #tpu.memory_space<vmem>>, vector<16x128xf32>
    tpu.vector_store %arg5[%c0_6, %c0_7], %7 {strides = array<i32>} : memref<16x128xf32, #tpu.memory_space<vmem>>, vector<16x128xf32>,
    %c0_i32_8 = arith.constant 0 : i32
    %9 = arith.cmpi eq, %arg1, %c0_i32_8 : i32
    %10 = arith.extui %9 : i1 to i32
    %c0_i32_9 = arith.constant 0 : i32
    %11 = arith.cmpi ne, %10, %c0_i32_9 : i32
    scf.if %11 {
      %c0_10 = arith.constant 0 : index
      %c0_11 = arith.constant 0 : index
      %12 = vector.load %arg5[%c0_10, %c0_11] : memref<16x128xf32, #tpu.memory_space<vmem>>, vector<16x128xf32>
      %cst_12 = arith.constant 0.000000e+00 : f32
      %13 = vector.broadcast %cst_12 : f32 to vector<16x128xf32>
      %14 = arith.maximumf %12, %13 : vector<16x128xf32>
      %15 = arith.truncf %14 : vector<16x128xf32> to vector<16x128xbf16>
      %c0_13 = arith.constant 0 : index
      %c0_14 = arith.constant 0 : index
      %16 = vector.load %arg4[%c0_13, %c0_14] : memref<16x128xbf16, #tpu.memory_space<vmem>>, vector<16x128xbf16>
      tpu.vector_store %arg4[%c0_13, %c0_14], %15 {strides = array<i32>} : memref<16x128xbf16, #tpu.memory_space<vmem>>, vector<16x128xbf16>,
    } else {
    }
    return
  }
  func.func @transform_0(%arg0: i32, %arg1: i32) -> (i32, i32) {
    %c0_i32 = arith.constant 0 : i32
    %c0_i32_0 = arith.constant 0 : i32
    return %c0_i32, %arg1 : i32, i32
  }
  func.func @transform_1(%arg0: i32, %arg1: i32) -> (i32, i32) {
    %c0_i32 = arith.constant 0 : i32
    return %arg1, %arg0 : i32, i32
  }
  func.func @transform_2(%arg0: i32, %arg1: i32) -> (i32, i32) {
    %c0_i32 = arith.constant 0 : i32
    %c0_i32_0 = arith.constant 0 : i32
    return %c0_i32, %arg0 : i32, i32
  }
}

</mosaic_0001>

<bundles_post_ra>
// kernel: tpu_custom_call.1
= control target key start
LH: loop header
LB: loop body
LE: loop exit
PB: predicated region body
PF: predicated region fallthrough
CT: control target
= control target key end

     0   :  { %7 = vsyncpa [#allocation4], 0  ;;  %s403_s0 = inlined_call_operand.hbm [shape: bf16[16,128], index: 0, kind: input, shape index: {}]   ;;  %s404_s1 = inlined_call_operand.hbm [shape: bf16[128,128], index: 1, kind: input, shape index: {}]   ;;  %s405_s2 = inlined_call_operand.hbm [shape: bf16[16,128], index: 2, kind: output, shape index: {}]  }
   0x1   :  { %8 = vsyncpa [#allocation7], 0 }
   0x2   :  { %9 = vsyncpa [#allocation5], 0  ;;  %s336_s9 = smov [#allocation3]   ;;  %s264_s13 = scalar_lea.hbm %s403_s0, 128 }
   0x3   :  { %s15_s10 = sshll.u32 %s336_s9, 4  ;;  %p265_p0 = scmp.ne.s32.totalorder %s403_s0, %s264_s13  ;;  %s16_s10 = int_to_ptr.vmem [resolvable:$true] %s15_s10 }
   0x4   :  { %p268_p1 = scmp.lt.u32.totalorder %s264_s13, %s403_s0 }
   0x6   :  { %p270_p2 = pnand %p268_p1, %p265_p0 }
   0x8   :  { %273 = shalt.err (!%p270_p2)
}
   0x9   :  { %s274_s18 = scalar_lea.vmem %s16_s10, 128  ;;  %p279_p4 = scmp.lt.s32.totalorder %s16_s10, %s16_s10 }
   0xa   :  { %p275_p3 = scmp.ne.s32.totalorder %s16_s10, %s274_s18  ;;  %p280_p5 = scmp.lt.s32.totalorder %s274_s18, %s274_s18 }
   0xc   :  { %p281_p6 = por %p280_p5, %p279_p4 }
   0xe   :  { %p282_p7 = pnand %p281_p6, %p275_p3 }
  0x10   :  { %285 = shalt.err (!%p282_p7)
}
  0x11   :  { %s337_s19 = smov 64   ;;  %s338_s20 = smov 4  }
  0x12   :  { %21 = dma.hbm_to_vmem [thread:$0]  %s403_s0, 128, %s16_s10, [#allocation4], %s337_s19, %s337_s19, %s338_s20  }
  0x13   :  { %s339_s23 = smov [#allocation6]   ;;  %s286_s27 = scalar_lea.hbm %s404_s1, 1024 }
  0x14   :  { %s27_s24 = sshll.u32 %s339_s23, 4  ;;  %p287_p8 = scmp.ne.s32.totalorder %s404_s1, %s286_s27  ;;  %s28_s24 = int_to_ptr.vmem [resolvable:$true] %s27_s24 }
  0x15   :  { %p290_p9 = scmp.lt.u32.totalorder %s286_s27, %s404_s1 }
  0x17   :  { %p292_p10 = pnand %p290_p9, %p287_p8 }
  0x19   :  { %295 = shalt.err (!%p292_p10)
}
  0x1a   :  { %s296_s4 = scalar_lea.vmem %s28_s24, 1024  ;;  %p301_p12 = scmp.lt.s32.totalorder %s28_s24, %s28_s24 }
  0x1b   :  { %p297_p11 = scmp.ne.s32.totalorder %s28_s24, %s296_s4  ;;  %p302_p13 = scmp.lt.s32.totalorder %s296_s4, %s296_s4 }
  0x1d   :  { %p303_p0 = por %p302_p13, %p301_p12 }
  0x1f   :  { %p304_p1 = pnand %p303_p0, %p297_p11 }
  0x21   :  { %307 = shalt.err (!%p304_p1)
}
  0x22   :  { %33 = dma.hbm_to_vmem [thread:$0]  %s404_s1, 1024, %s28_s24, [#allocation7], %s337_s19, %s337_s19, %s338_s20  }
  0x23   :  { %330 = dma.done.wait [#allocation4], 128  }
  0x24   :  { %331 = vsyncadd [#allocation4], 4294967168 }
  0x25   :  { %332 = dma.done.wait [#allocation7], 1024  }
  0x26   :  { %333 = vsyncadd [#allocation7], 4294966272  ;;  %v340_v0 = vmov 0.0   ;;  %vm341_vm0 = vmmov 0   ;;  %v255_v1 = vld [vmem:[#allocation6] sm:$0xff]   ;;  %v256_v2 = vld [vmem:[#allocation6 + $0x8] sm:$0xff]  }
  0x27   :  { %228 = vmatprep.subr.bf16.mxu0 %v340_v0  ;;  %244 = vmatprep.mubr.msk.bf16.mxu0 %vm341_vm0, %v340_v0  ;;  %v257_v3 = vld [vmem:[#allocation6 + $0x10] sm:$0xff]   ;;  %v258_v4 = vld [vmem:[#allocation6 + $0x18] sm:$0xff]   ;;  %v259_v5 = vld [vmem:[#allocation6 + $0x20] sm:$0xff]   ;;  %s342_s1 = smov [#allocation8]  }
  0x28   :  { %229 = vmatpush3.bf16.msra.mxu0 %v255_v1  ;;  %v260_v6 = vld [vmem:[#allocation6 + $0x28] sm:$0xff]   ;;  %v261_v7 = vld [vmem:[#allocation6 + $0x30] sm:$0xff]   ;;  %v262_v8 = vld [vmem:[#allocation6 + $0x38] sm:$0xff]   ;;  %s188_s6 = sshll.u32 %s342_s1, 4  ;;  %s189_s6 = int_to_ptr.vmem [resolvable:$true] %s188_s6 }
  0x29   :  { %230 = vmatprep.subr.bf16.mxu0 %v340_v0  ;;  %v263_v9 = vld [vmem:[#allocation3] sm:$0xff]   ;;  %s308_s7 = scalar_lea.vmem %s189_s6, 128  ;;  %p313_p3 = scmp.lt.s32.totalorder %s189_s6, %s189_s6 }
  0x2a   :  { %p309_p2 = scmp.ne.s32.totalorder %s189_s6, %s308_s7  ;;  %p314_p4 = scmp.lt.s32.totalorder %s308_s7, %s308_s7 }
  0x2c   :  { %231 = vmatpush3.bf16.msra.mxu0 %v256_v2  ;;  %p315_p5 = por %p314_p4, %p313_p3 }
  0x2d   :  { %232 = vmatprep.subr.bf16.mxu0 %v340_v0 }
  0x2e   :  { %p316_p6 = pnand %p315_p5, %p309_p2 }
  0x30   :  { %233 = vmatpush3.bf16.msra.mxu0 %v257_v3 }
  0x31   :  { %234 = vmatprep.subr.bf16.mxu0 %v340_v0 }
  0x34   :  { %235 = vmatpush3.bf16.msra.mxu0 %v258_v4 }
  0x35   :  { %236 = vmatprep.subr.bf16.mxu0 %v340_v0 }
  0x38   :  { %237 = vmatpush3.bf16.msra.mxu0 %v259_v5 }
  0x39   :  { %238 = vmatprep.subr.bf16.mxu0 %v340_v0 }
  0x3c   :  { %239 = vmatpush3.bf16.msra.mxu0 %v260_v6 }
  0x3d   :  { %240 = vmatprep.subr.bf16.mxu0 %v340_v0 }
  0x40   :  { %241 = vmatpush3.bf16.msra.mxu0 %v261_v7 }
  0x41   :  { %242 = vmatprep.subr.bf16.mxu0 %v340_v0 }
  0x44   :  { %243 = vmatpush3.bf16.msra.mxu0 %v262_v8 }
  0x47   :  { %245 = vmatmul.mubr.bf16.vlgmr.msra.gmra.mrb[0].mxu0 %v263_v9 }
 0x11a   :  { %v155_v10 = vpop.f32.mrb[0].mxu0 }
 0x11b   :  { %v246_v11 = vpop.f32.mrb[1].mxu0  ;;  %v171_v13 = vmax.f32 %v155_v10, 0.0 }
 0x11c   :  { %v158_v12 = vpop.f32.mrb[2].mxu0 }
 0x11d   :  { %v172_v14 = vmax.f32 %v158_v12, 0.0  ;;  %v247_v15 = vpop.f32.mrb[3].mxu0 }
 0x11f   :  { %v217_v16 = vpack.c.bf16 %v172_v14, %v171_v13 }
 0x121   :  { %218 = vst [vmem:[#allocation8] sm:$0xff] %v217_v16  }
 0x122   :  { %319 = shalt.err (!%p316_p6)
}
 0x123   :  { %s320_s10 = scalar_lea.hbm %s405_s2, 128 }
 0x124   :  { %p321_p7 = scmp.ne.s32.totalorder %s405_s2, %s320_s10  ;;  %p324_p8 = scmp.lt.u32.totalorder %s320_s10, %s405_s2 }
 0x126   :  { %p326_p9 = pnand %p324_p8, %p321_p7 }
 0x128   :  { %329 = shalt.err (!%p326_p9)
}
 0x129   :  { %194 = dma.vmem_to_hbm [thread:$0]  %s189_s6, 128, %s405_s2, [#allocation5], %s337_s19, %s337_s19, %s338_s20  }
 0x12a   :  { %334 = dma.done.wait [#allocation5], 128  }
 0x12b   :  { %335 = vsyncadd [#allocation5], 4294967168 }
 0x12c   :  { %198 = vsyncpa [#allocation4], 1 }
 0x12d   :  { %199 = vsyncpa [#allocation7], 1 }
 0x12e   :  { %200 = vsyncpa [#allocation5], 1 }

</bundles_post_ra>
